<compile_context>
chip_gen: v5e
topology: v5e:2x2
jax: 0.10.0
libtpu: 0.0.40
codegen_flags: <defaults>
</compile_context>

<pallas_src>
import jax
import jax.numpy as jnp
from jax.experimental import pallas as pl
from jax.experimental.pallas import tpu as pltpu


def _round_up(x, m):
    return ((x + m - 1) // m) * m


def classifier_kernel(x_ref, w1_ref, b1_ref, w2_ref, scalars_ref, out_ref):
    """One TILE_B-row slab: (Linear+BN folded) -> PReLU -> dot(w2) -> sigmoid."""
    alpha = scalars_ref[0]   # PReLU slope (SMEM scalar)
    b2 = scalars_ref[1]      # output-layer bias (SMEM scalar)

    # Hidden layer: bf16 x / bf16 folded-W1 on the MXU, f32 accumulation.
    h = jnp.dot(x_ref[...], w1_ref[...], preferred_element_type=jnp.float32)
    h = h + b1_ref[...]                        # folded BN+Linear bias
    h = jnp.where(h >= 0.0, h, alpha * h)      # PReLU

    # Output layer (out_features = 1): VPU multiply + lane (XLU) reduction
    # instead of an N=1 MXU matmul.
    o = jnp.sum(h * w2_ref[...], axis=-1, keepdims=True) + b2

    # Sigmoid: exp and approximate reciprocal both ride the (idle) EUP slot.
    out_ref[...] = pl.reciprocal(1.0 + jnp.exp(-o), approx=True)


def classifier_forward(x, params, *, tile_b=None):
    """x: [batch, input_dim] float32 -> [batch, 1] float32 (eval-mode forward)."""
    batch, input_dim = x.shape
    w1 = params["w1"]            # [input_dim, hidden_p]  bf16, BN folded in
    b1 = params["b1"]            # [1, hidden_p]          f32, BN folded in
    w2 = params["w2_row"]        # [1, hidden_p]          f32
    scalars = params["scalars"]  # [2]                    f32: (PReLU alpha, out bias)
    hidden_p = w1.shape[1]

    if tile_b is None:
        # Double-buffered bf16 x tiles must fit comfortably inside the scoped
        # VMEM limit on every chip (v7x: 64 MiB physical / 32 MiB scoped, half
        # of v5e/v6e). Budget ~8 MiB for the pipelined x stream.
        x_budget_bytes = 8 * 1024 * 1024
        max_rows = max(8, (x_budget_bytes // (2 * input_dim * 2)) // 8 * 8)
        tile_b = min(512, max_rows)
    tile_b = max(8, min(_round_up(tile_b, 8), _round_up(batch, 8)))

    padded = _round_up(batch, tile_b)
    x_bf16 = x.astype(jnp.bfloat16)
    if padded != batch:
        x_bf16 = jnp.pad(x_bf16, ((0, padded - batch), (0, 0)))

    grid = (padded // tile_b,)
    out = pl.pallas_call(
        classifier_kernel,
        out_shape=jax.ShapeDtypeStruct((padded, 1), jnp.float32),
        grid=grid,
        in_specs=[
            # Activations: one TILE_B slab per grid step (auto double-buffered).
            pl.BlockSpec((tile_b, input_dim), lambda i: (i, 0)),
            # Weights / biases: constant index maps -> resident in VMEM.
            pl.BlockSpec((input_dim, hidden_p), lambda i: (0, 0)),
            pl.BlockSpec((1, hidden_p), lambda i: (0, 0)),
            pl.BlockSpec((1, hidden_p), lambda i: (0, 0)),
            # Scalars (PReLU alpha, output bias) live in SMEM.
            pl.BlockSpec(memory_space=pltpu.MemorySpace.SMEM),
        ],
        out_specs=pl.BlockSpec((tile_b, 1), lambda i: (i, 0)),
        compiler_params=pltpu.CompilerParams(
            dimension_semantics=("parallel",),  # shard batch tiles across TCs (v7x)
        ),
    )(x_bf16, w1, b1, w2, scalars)
    return out[:batch]


def xavier_uniform(key, shape):
    fan_out, fan_in = shape                  # torch nn.Linear.weight layout [out, in]
    bound = (6.0 / (fan_in + fan_out)) ** 0.5
    return jax.random.uniform(key, shape, jnp.float32, -bound, bound)


def init_torch_params(key, input_dim, hidden_dim):
    """Parameters exactly as the PyTorch module initializes them."""
    k1, k2 = jax.random.split(key)
    return {
        "w1": xavier_uniform(k1, (hidden_dim, input_dim)),   # [out, in]
        "b1": jnp.zeros((hidden_dim,), jnp.float32),
        "bn_gamma": jnp.ones((hidden_dim,), jnp.float32),
        "bn_beta": jnp.zeros((hidden_dim,), jnp.float32),
        "bn_mean": jnp.zeros((hidden_dim,), jnp.float32),    # running stats (eval)
        "bn_var": jnp.ones((hidden_dim,), jnp.float32),
        "bn_eps": jnp.float32(1e-5),
        "prelu_alpha": jnp.float32(0.25),                    # nn.PReLU() default
        "w2": xavier_uniform(k2, (1, hidden_dim)),           # [out=1, in=hidden]
        "b2": jnp.zeros((1,), jnp.float32),
    }


def prepare_kernel_params(p):
    """Fold eval-mode BatchNorm into Linear1 and pad hidden dim to 128 lanes."""
    scale = p["bn_gamma"] / jnp.sqrt(p["bn_var"] + p["bn_eps"])   # [hidden]
    shift = p["bn_beta"] - p["bn_mean"] * scale
    w1_f = p["w1"].T * scale[None, :]          # [in, hidden]
    b1_f = p["b1"] * scale + shift             # [hidden]
    w2_row = p["w2"].reshape(1, -1)            # [1, hidden]

    hidden = w1_f.shape[1]
    hidden_p = _round_up(hidden, 128)          # fill full 128-lane vregs / MXU N
    pad = hidden_p - hidden
    if pad:
        w1_f = jnp.pad(w1_f, ((0, 0), (0, pad)))
        b1_f = jnp.pad(b1_f, ((0, pad),))
        w2_row = jnp.pad(w2_row, ((0, 0), (0, pad)))

    return {
        "w1": w1_f.astype(jnp.bfloat16),
        "b1": b1_f.reshape(1, hidden_p).astype(jnp.float32),
        "w2_row": w2_row.astype(jnp.float32),
        "scalars": jnp.stack([jnp.float32(p["prelu_alpha"]),
                              p["b2"][0]]).astype(jnp.float32),
    }


if __name__ == "__main__":
    INPUT_DIM = 128                 # default_value(params.get('input_dim'), 128)
    HIDDEN_DIM = INPUT_DIM // 2     # default hidden_dims = [input_dim // 2]
    BATCH = 8

    key = jax.random.PRNGKey(0)
    k_x, k_p = jax.random.split(key)
    x = jax.random.normal(k_x, (BATCH, INPUT_DIM), jnp.float32)

    torch_params = init_torch_params(k_p, INPUT_DIM, HIDDEN_DIM)
    kernel_params = prepare_kernel_params(torch_params)

    out = classifier_forward(x, kernel_params)
    out = jax.block_until_ready(out)
    assert out.shape == (BATCH, 1)

    # Pure-JAX reference following the un-folded eval-mode module exactly (f32).
    p = torch_params
    h_ref = x @ p["w1"].T + p["b1"]
    h_ref = (h_ref - p["bn_mean"]) / jnp.sqrt(p["bn_var"] + p["bn_eps"])
    h_ref = p["bn_gamma"] * h_ref + p["bn_beta"]
    h_ref = jnp.where(h_ref >= 0, h_ref, p["prelu_alpha"] * h_ref)
    ref = jax.nn.sigmoid(h_ref @ p["w2"].T + p["b2"])

    # Tolerance loosened vs. the pure-f32 path: the kernel uses bf16 x / W1'
    # (f32 MXU accumulation) and an approximate EUP reciprocal in the sigmoid.
    assert jnp.allclose(out, ref, atol=2e-2), "mismatch vs JAX reference"
    print("KERNEL_OK")
</pallas_src>

<mosaic_0001>
module attributes {stable_mosaic.version = 11 : i64} {
  func.func @classifier_kernel(%arg0: i32, %arg1: memref<8x128xbf16, #tpu.memory_space<vmem>>, %arg2: memref<128x128xbf16, #tpu.memory_space<vmem>>, %arg3: memref<1x128xf32, #tpu.memory_space<vmem>>, %arg4: memref<1x128xf32, #tpu.memory_space<vmem>>, %arg5: memref<2xf32, #tpu.memory_space<smem>>, %arg6: memref<8x1xf32, #tpu.memory_space<vmem>>) attributes {dimension_semantics = [#tpu.dimension_semantics<parallel>], iteration_bounds = array<i64: 1>, scalar_prefetch = 0 : i64, scratch_operands = 0 : i64, tpu.core_type = #tpu.core_type<tc>, window_params = [{transform_indices = @transform_0, window_bounds = array<i64: 8, 128>}, {pipeline_mode = #tpu.pipeline_mode<synchronous>, transform_indices = @transform_1, window_bounds = array<i64: 128, 128>}, {pipeline_mode = #tpu.pipeline_mode<synchronous>, transform_indices = @transform_2, window_bounds = array<i64: 1, 128>}, {pipeline_mode = #tpu.pipeline_mode<synchronous>, transform_indices = @transform_3, window_bounds = array<i64: 1, 128>}, {transform_indices = @transform_4, window_bounds = array<i64: 2>}, {transform_indices = @transform_5, window_bounds = array<i64: 8, 1>}]} {
    %c0 = arith.constant 0 : index
    %0 = memref.load %arg5[%c0] : memref<2xf32, #tpu.memory_space<smem>>
    %c1 = arith.constant 1 : index
    %1 = memref.load %arg5[%c1] : memref<2xf32, #tpu.memory_space<smem>>
    %c0_0 = arith.constant 0 : index
    %c0_1 = arith.constant 0 : index
    %2 = vector.load %arg1[%c0_0, %c0_1] : memref<8x128xbf16, #tpu.memory_space<vmem>>, vector<8x128xbf16>
    %c0_2 = arith.constant 0 : index
    %c0_3 = arith.constant 0 : index
    %3 = vector.load %arg2[%c0_2, %c0_3] : memref<128x128xbf16, #tpu.memory_space<vmem>>, vector<128x128xbf16>
    %cst = arith.constant dense<0.000000e+00> : vector<8x128xf32>
    %4 = tpu.matmul %2, %3, %cst {dimension_numbers = #tpu.dot_dimension_numbers<[1], [0], [0], [1], [0, 0, 1, 1], [], []>} : vector<8x128xbf16>, vector<128x128xbf16>, vector<8x128xf32> -> vector<8x128xf32>
    %c0_4 = arith.constant 0 : index
    %c0_5 = arith.constant 0 : index
    %5 = vector.load %arg3[%c0_4, %c0_5] : memref<1x128xf32, #tpu.memory_space<vmem>>, vector<1x128xf32>
    %6 = vector.broadcast %5 : vector<1x128xf32> to vector<8x128xf32>
    %7 = arith.addf %4, %6 : vector<8x128xf32>
    %cst_6 = arith.constant 0.000000e+00 : f32
    %8 = vector.broadcast %cst_6 : f32 to vector<8x128xf32>
    %9 = arith.cmpf oge, %7, %8 : vector<8x128xf32>
    %10 = vector.broadcast %0 : f32 to vector<8x128xf32>
    %11 = arith.mulf %10, %7 : vector<8x128xf32>
    %12 = arith.select %9, %7, %11 : vector<8x128xi1>, vector<8x128xf32>
    %c0_7 = arith.constant 0 : index
    %c0_8 = arith.constant 0 : index
    %13 = vector.load %arg4[%c0_7, %c0_8] : memref<1x128xf32, #tpu.memory_space<vmem>>, vector<1x128xf32>
    %14 = vector.broadcast %13 : vector<1x128xf32> to vector<8x128xf32>
    %15 = arith.mulf %12, %14 : vector<8x128xf32>
    %cst_9 = arith.constant dense<0.000000e+00> : vector<8xf32>
    %16 = vector.multi_reduction <add>, %15, %cst_9 [1] : vector<8x128xf32> to vector<8xf32>
    %17 = vector.shape_cast %16 : vector<8xf32> to vector<8x1xf32>
    %18 = vector.broadcast %1 : f32 to vector<8x1xf32>
    %19 = arith.addf %17, %18 : vector<8x1xf32>
    %cst_10 = arith.constant 0.000000e+00 : f32
    %20 = vector.broadcast %cst_10 : f32 to vector<8x1xf32>
    %21 = arith.subf %20, %19 : vector<8x1xf32>
    %22 = math.exp %21 : vector<8x1xf32>
    %cst_11 = arith.constant 1.000000e+00 : f32
    %23 = vector.broadcast %cst_11 : f32 to vector<8x1xf32>
    %24 = arith.addf %23, %22 : vector<8x1xf32>
    %25 = tpu.reciprocal %24 {approx = true} : vector<8x1xf32> -> vector<8x1xf32>
    %c0_12 = arith.constant 0 : index
    %c0_13 = arith.constant 0 : index
    %26 = vector.load %arg6[%c0_12, %c0_13] : memref<8x1xf32, #tpu.memory_space<vmem>>, vector<8x1xf32>
    tpu.vector_store %arg6[%c0_12, %c0_13], %25 {strides = array<i32>} : memref<8x1xf32, #tpu.memory_space<vmem>>, vector<8x1xf32>,
    return
  }
  func.func @transform_0(%arg0: i32) -> (i32, i32) {
    %c0_i32 = arith.constant 0 : i32
    %c0_i32_0 = arith.constant 0 : i32
    return %arg0, %c0_i32 : i32, i32
  }
  func.func @transform_1(%arg0: i32) -> (i32, i32) {
    %c0_i32 = arith.constant 0 : i32
    %c0_i32_0 = arith.constant 0 : i32
    %c0_i32_1 = arith.constant 0 : i32
    return %c0_i32, %c0_i32_0 : i32, i32
  }
  func.func @transform_2(%arg0: i32) -> (i32, i32) {
    %c0_i32 = arith.constant 0 : i32
    %c0_i32_0 = arith.constant 0 : i32
    %c0_i32_1 = arith.constant 0 : i32
    return %c0_i32, %c0_i32_0 : i32, i32
  }
  func.func @transform_3(%arg0: i32) -> (i32, i32) {
    %c0_i32 = arith.constant 0 : i32
    %c0_i32_0 = arith.constant 0 : i32
    %c0_i32_1 = arith.constant 0 : i32
    return %c0_i32, %c0_i32_0 : i32, i32
  }
  func.func @transform_4(%arg0: i32) -> i32 {
    %c0_i32 = arith.constant 0 : i32
    %c0_i32_0 = arith.constant 0 : i32
    return %c0_i32 : i32
  }
  func.func @transform_5(%arg0: i32) -> (i32, i32) {
    %c0_i32 = arith.constant 0 : i32
    %c0_i32_0 = arith.constant 0 : i32
    return %arg0, %c0_i32 : i32, i32
  }
}

</mosaic_0001>

<bundles_post_ra>
// kernel: tpu_custom_call.1
= control target key start
LH: loop header
LB: loop body
LE: loop exit
PB: predicated region body
PF: predicated region fallthrough
CT: control target
= control target key end

     0   :  { %10 = vsyncpa [#allocation3], 0  ;;  %s345_s0 = inlined_call_operand.hbm [shape: bf16[8,128], index: 0, kind: input, shape index: {}]   ;;  %s346_s1 = inlined_call_operand.hbm [shape: bf16[128,128], index: 1, kind: input, shape index: {}]   ;;  %s347_s2 = inlined_call_operand.vmem [shape: f32[1,128], index: 2, kind: input, shape index: {}]   ;;  %s348_s3 = inlined_call_operand.vmem [shape: f32[1,128], index: 3, kind: input, shape index: {}]   ;;  %s349_s4 = inlined_call_operand.vmem [shape: f32[2], index: 4, kind: input, shape index: {}]   ;;  %s350_s5 = inlined_call_operand.vmem [shape: f32[8,1], index: 5, kind: output, shape index: {}]  }
   0x1   :  { %11 = vsyncpa [#allocation6], 0  ;;  %s18_s20 = sshll.u32 %s345_s0, 4  ;;  %s19_s20 = int_to_ptr.hbm [resolvable:$true] %s18_s20 }
   0x2   :  { %12 = vsyncpa [#allocation4], 0  ;;  %s292_s21 = smov [#allocation2]   ;;  %s28_s25 = sshll.u32 %s346_s1, 4  ;;  %s29_s25 = int_to_ptr.hbm [resolvable:$true] %s28_s25 }
   0x3   :  { %s20_s22 = sshll.u32 %s292_s21, 4  ;;  %s293_s26 = smov [#allocation5]   ;;  %s21_s22 = int_to_ptr.vmem [resolvable:$true] %s20_s22 }
   0x4   :  { %23 = dma.hbm_to_vmem [thread:$0]  %s19_s20, 64, %s21_s22, [#allocation3]  }
   0x5   :  { %s30_s27 = sshll.u32 %s293_s26, 4  ;;  %s294_s28 = smov 64   ;;  %s31_s27 = int_to_ptr.vmem [resolvable:$true] %s30_s27 }
   0x6   :  { %s295_s29 = smov 4   ;;  %s46_s0 = sshll.u32 %s349_s4, 4  ;;  %s47_s0 = int_to_ptr.vmem [resolvable:$true] %s46_s0 }
   0x7   :  { %36 = dma.hbm_to_vmem [thread:$0]  %s29_s25, 1024, %s31_s27, [#allocation6], %s294_s28, %s294_s28, %s295_s29  }
   0x8   :  { %s296_s7 = smov [#allocation7]  }
   0x9   :  { %49 = dma.vmem_to_smem %s47_s0, 16, %s296_s7, [#allocation4]  }
   0xa   :  { %286 = dma.done.wait [#allocation3], 64  }
   0xb   :  { %287 = vsyncadd [#allocation3], 4294967232 }
   0xc   :  { %288 = dma.done.wait [#allocation6], 1024  }
   0xd   :  { %289 = vsyncadd [#allocation6], 4294966272 }
   0xe   :  { %290 = dma.done.wait [#allocation4], 16  }
   0xf   :  { %291 = vsyncadd [#allocation4], 4294967280 }
  0x10   :  { %62 = sfence }
  0x11   :  { %v214_v0 = vld [vmem:[#allocation5 + $0x38] sm:$0xff]  ;;  %v213_v1 = vld [vmem:[#allocation5 + $0x30] sm:$0xff]  ;;  %v212_v2 = vld [vmem:[#allocation5 + $0x28] sm:$0xff]  ;;  %s63_s1 = sld [smem:[#allocation7]]  ;;  %vm165_vm1 = vcmask 7168  }
  0x12   :  { %134 = vmatpush.bf16.msra.mxu0 %v214_v0  ;;  %v211_v3 = vld [vmem:[#allocation5 + $0x20] sm:$0xff]  ;;  %v210_v4 = vld [vmem:[#allocation5 + $0x18] sm:$0xff]  ;;  %v209_v5 = vld [vmem:[#allocation5 + $0x10] sm:$0xff]  ;;  %s174_s11 = sld [smem:[#allocation7 + $0x1]] }
  0x13   :  { %v208_v6 = vld [vmem:[#allocation5 + $0x8] sm:$0xff]  ;;  %v207_v7 = vld [vmem:[#allocation5] sm:$0xff]  ;;  %v65_v8 = vld [vmem:[#allocation2] sm:$0xf] }
  0x14   :  { %v220_v9 = vld [vmem:[%s347_s2] ss:$0 sm:$0xff] }
  0x15   :  { %v221_v13 = vld [vmem:[%s348_s3] ss:$0 sm:$0xff] }
  0x16   :  { %135 = vmatpush.bf16.msra.mxu0 %v213_v1 }
  0x17   :  { %v148_v11 = vstv %s63_s1 }
  0x18   :  { %v158_v18 = vstv %s174_s11 }
  0x1a   :  { %136 = vmatpush.bf16.msra.mxu0 %v212_v2 }
  0x1e   :  { %137 = vmatpush.bf16.msra.mxu0 %v211_v3 }
  0x22   :  { %138 = vmatpush.bf16.msra.mxu0 %v210_v4 }
  0x26   :  { %139 = vmatpush.bf16.msra.mxu0 %v209_v5 }
  0x2a   :  { %140 = vmatpush.bf16.msra.mxu0 %v208_v6 }
  0x2e   :  { %141 = vmatpush.bf16.msra.mxu0 %v207_v7 }
  0x31   :  { %142 = vmatmul.bf16.vlgmr.msra.gmra.mxu0 %v65_v8 }
  0xae   :  { %v143_v10 = vpop.f32.mrf.mxu0 }
  0xaf   :  { %v144_v12 = vadd.f32 %v220_v9, %v143_v10 }
  0xb1   :  { %v149_v14 = vmul.f32 %v148_v11, %v144_v12  ;;  %vm147_vm0 = vcmp.ge.f32.partialorder %v144_v12, 0.0 }
  0xb3   :  { %v150_v15 = vsel %vm147_vm0, %v144_v12, %v149_v14 }
  0xb4   :  { %v155_v16 = vmul.f32 %v221_v13, %v150_v15 }
  0xb6   :  { %v145_v17 = vpop.f32.mrf.mxu0  ;;  %156 = vadd.xlane.f32.xlu0 %v155_v16 }
 0x129   :  { %v157_v19 = vpop.xlane.xlu0 %156 }
 0x12a   :  { %v159_v20 = vadd.f32 %v158_v18, %v157_v19 }
 0x12c   :  { %v160_v21 = vsub.f32 0.0, %v159_v20 }
 0x12e   :  { %v161_v22 = vmul.f32 1.442695, %v160_v21 }
 0x130   :  { %222 = vpow2.f32 %v161_v22 }
 0x136   :  { %v223_v23 = vpop.eup %222 }
 0x137   :  { %v163_v24 = vadd.f32 1.0, %v223_v23 }
 0x139   :  { %224 = vrcp.f32 %v163_v24 }
 0x13f   :  { %v225_v25 = vpop.eup %224 }
 0x140   :  { %166 = vst.msk [vmem:[%s350_s5] sm:$0xff] %vm165_vm1, %v225_v25 }
 0x141   :  { %171 = vsyncpa [#allocation3], 1 }
 0x142   :  { %172 = vsyncpa [#allocation6], 1 }
 0x143   :  { %173 = vsyncpa [#allocation4], 1 }

</bundles_post_ra>
